<compile_context>
chip_gen: v5e
topology: v5e:2x2
jax: 0.10.0
libtpu: 0.0.40
codegen_flags: <defaults>
</compile_context>

<pallas_src>
import jax
import jax.numpy as jnp
from jax.experimental import pallas as pl
from jax.experimental.pallas import tpu as pltpu


# ----------------------------------------------------------------------------
# Fused CoordinateAttention kernel (one batch element per grid step)
# ----------------------------------------------------------------------------
def _coord_attn_kernel(x_ref, w1_ref, s1_ref, b1_ref, wh_ref, ww_ref, o_ref):
    x = x_ref[0]                                     # (H, W, Cp) f32, C on lanes
    H, W, _ = x.shape

    # --- coordinate pooling: mean over W (per row h) and mean over H (per col w)
    x_h = jnp.sum(x, axis=1) * (1.0 / W)             # (H, Cp)
    x_w = jnp.sum(x, axis=0) * (1.0 / H)             # (W, Cp)

    # --- shared 1x1 conv + folded BN + ReLU.
    # Two matmuls against the shared weight instead of concat([x_h, x_w]) +
    # split: concat / non-8-aligned slices would materialize VMEM copies.
    w1 = w1_ref[...]
    s1 = s1_ref[...]
    b1 = b1_ref[...]
    t_h = jnp.dot(x_h, w1, preferred_element_type=jnp.float32)   # (H, mid_p)
    t_w = jnp.dot(x_w, w1, preferred_element_type=jnp.float32)   # (W, mid_p)
    t_h = jnp.maximum(t_h * s1 + b1, 0.0)
    t_w = jnp.maximum(t_w * s1 + b1, 0.0)

    # --- F_h / F_w 1x1 convs + sigmoid gates (sigmoid runs on the EUP slot)
    s_h = jax.nn.sigmoid(
        jnp.dot(t_h, wh_ref[...], preferred_element_type=jnp.float32))  # (H, Cp)
    s_w = jax.nn.sigmoid(
        jnp.dot(t_w, ww_ref[...], preferred_element_type=jnp.float32))  # (W, Cp)

    # --- broadcast gating: out[h, w, c] = s_h[h, c] * s_w[w, c] * x[h, w, c]
    o_ref[0] = (s_h[:, None, :] * s_w[None, :, :] * x).astype(o_ref.dtype)


# ----------------------------------------------------------------------------
# Wrapper (NCHW in / NCHW out, matching the PyTorch module interface)
# ----------------------------------------------------------------------------
def _fold_bn(gamma, beta, mean, var, eps=1e-5):
    scale = gamma / jnp.sqrt(var + eps)
    bias = beta - mean * scale
    return scale.astype(jnp.float32)[None, :], bias.astype(jnp.float32)[None, :]


def _round_up(v, m):
    return (v + m - 1) // m * m


@jax.jit
def coordinate_attention(x_nchw, params):
    w1 = params["w1"].astype(jnp.float32)            # (C, mid)   == conv_1x1.weight.T
    w_fh = params["w_fh"].astype(jnp.float32)        # (mid, C)   == F_h.weight.T
    w_fw = params["w_fw"].astype(jnp.float32)        # (mid, C)   == F_w.weight.T
    scale1, bias1 = _fold_bn(params["bn_gamma"], params["bn_beta"],
                             params["bn_mean"], params["bn_var"])

    N, C, H, W = x_nchw.shape
    mid = w1.shape[1]

    # Pad channel and bottleneck widths up to full 128-lane tiles (zero pad =>
    # mathematical no-op): keeps every load/store and matmul lane-dense.
    C_p = _round_up(C, 128)
    mid_p = _round_up(mid, 128)
    w1_p = jnp.pad(w1, ((0, C_p - C), (0, mid_p - mid)))
    s1_p = jnp.pad(scale1, ((0, 0), (0, mid_p - mid)))
    b1_p = jnp.pad(bias1, ((0, 0), (0, mid_p - mid)))
    wh_p = jnp.pad(w_fh, ((0, mid_p - mid), (0, C_p - C)))
    ww_p = jnp.pad(w_fw, ((0, mid_p - mid), (0, C_p - C)))

    # NHWC inside the kernel: the channel dim maps to the 128-wide lane axis.
    x = jnp.transpose(x_nchw, (0, 2, 3, 1)).astype(jnp.float32)
    x = jnp.pad(x, ((0, 0), (0, 0), (0, 0), (0, C_p - C)))

    img_bytes = H * W * C_p * 4
    weight_bytes = (C_p * mid_p + 2 * mid_p * C_p + 2 * mid_p) * 4
    # in + out blocks, double-buffered, plus resident weights and headroom;
    # capped at v7x's 64 MiB physical VMEM.
    vmem_limit = int(min(64 * 2**20,
                         max(4 * 2**20,
                             4 * img_bytes + 2 * weight_bytes + (1 << 20))))

    flops_per_img = 4 * (H + W) * C_p * mid_p + 4 * H * W * C_p
    cost = pl.CostEstimate(
        flops=N * flops_per_img,
        transcendentals=N * (H + W) * C_p,
        bytes_accessed=N * 2 * img_bytes + weight_bytes,
    )

    out = pl.pallas_call(
        _coord_attn_kernel,
        out_shape=jax.ShapeDtypeStruct((N, H, W, C_p), jnp.float32),
        grid=(N,),
        in_specs=[
            pl.BlockSpec((1, H, W, C_p), lambda n: (n, 0, 0, 0)),
            pl.BlockSpec((C_p, mid_p), lambda n: (0, 0)),
            pl.BlockSpec((1, mid_p), lambda n: (0, 0)),
            pl.BlockSpec((1, mid_p), lambda n: (0, 0)),
            pl.BlockSpec((mid_p, C_p), lambda n: (0, 0)),
            pl.BlockSpec((mid_p, C_p), lambda n: (0, 0)),
        ],
        out_specs=pl.BlockSpec((1, H, W, C_p), lambda n: (n, 0, 0, 0)),
        input_output_aliases={0: 0},   # reuse the NHWC staging buffer for out
        compiler_params=pltpu.CompilerParams(
            dimension_semantics=("parallel",),   # v7x: shard batch over both TCs
            vmem_limit_bytes=vmem_limit,
        ),
        cost_estimate=cost,
    )(x, w1_p, s1_p, b1_p, wh_p, ww_p)

    return jnp.transpose(out[..., :C], (0, 3, 1, 2))  # back to NCHW


# ----------------------------------------------------------------------------
# Pure-JAX reference mirroring the PyTorch forward (NCHW), for a sanity check
# ----------------------------------------------------------------------------
def reference(x_nchw, params, eps=1e-5):
    x = x_nchw.astype(jnp.float32)
    N, C, H, W = x.shape
    w1, w_fh, w_fw = params["w1"], params["w_fh"], params["w_fw"]
    g, b = params["bn_gamma"], params["bn_beta"]
    m, v = params["bn_mean"], params["bn_var"]

    x_h = jnp.mean(x, axis=3)                         # (N, C, H)  (== permuted x_h)
    x_w = jnp.mean(x, axis=2)                         # (N, C, W)
    cat = jnp.concatenate([x_h, x_w], axis=2)         # (N, C, H+W)
    t = jnp.einsum("ncl,cm->nml", cat, w1)            # conv_1x1 -> (N, mid, H+W)
    t = (t - m[None, :, None]) / jnp.sqrt(v[None, :, None] + eps)
    t = t * g[None, :, None] + b[None, :, None]       # BN (eval mode)
    t = jnp.maximum(t, 0.0)                           # ReLU
    s_h = jax.nn.sigmoid(jnp.einsum("nmh,mc->nch", t[:, :, :H], w_fh))  # (N, C, H)
    s_w = jax.nn.sigmoid(jnp.einsum("nmw,mc->ncw", t[:, :, H:], w_fw))  # (N, C, W)
    return s_h[:, :, :, None] * s_w[:, :, None, :] * x


if __name__ == "__main__":
    # Small shapes consistent with the module: reduction defaults to 16, so
    # channel must be a multiple of 16; C=64 also exercises the lane-padding
    # path (C and mid are zero-padded to 128 lanes inside the wrapper).
    N, C, H, W = 2, 64, 16, 16
    reduction = 16
    mid = C // reduction                               # 4

    key = jax.random.PRNGKey(0)
    kx, k1, k2, k3, k4, k5, k6, k7 = jax.random.split(key, 8)
    x = jax.random.normal(kx, (N, C, H, W), dtype=jnp.float32)
    params = {
        "w1":   0.1 * jax.random.normal(k1, (C, mid), dtype=jnp.float32),
        "w_fh": 0.1 * jax.random.normal(k2, (mid, C), dtype=jnp.float32),
        "w_fw": 0.1 * jax.random.normal(k3, (mid, C), dtype=jnp.float32),
        "bn_gamma": 1.0 + 0.1 * jax.random.normal(k4, (mid,), dtype=jnp.float32),
        "bn_beta": 0.05 * jax.random.normal(k5, (mid,), dtype=jnp.float32),
        "bn_mean": 0.02 * jax.random.normal(k6, (mid,), dtype=jnp.float32),
        "bn_var": 1.0 + 0.1 * jnp.abs(jax.random.normal(k7, (mid,), dtype=jnp.float32)),
    }

    out = jax.block_until_ready(coordinate_attention(x, params))
    ref = jax.block_until_ready(reference(x, params))

    assert out.shape == (N, C, H, W)
    assert jnp.allclose(out, ref, rtol=1e-2, atol=1e-2), (
        "mismatch vs reference: max abs err "
        f"{jnp.max(jnp.abs(out - ref))}")
    print("KERNEL_OK")
</pallas_src>

<mosaic_0001>
module attributes {stable_mosaic.version = 11 : i64} {
  func.func @_coord_attn_kernel(%arg0: i32, %arg1: memref<1x16x16x128xf32, #tpu.memory_space<vmem>>, %arg2: memref<128x128xf32, #tpu.memory_space<vmem>>, %arg3: memref<1x128xf32, #tpu.memory_space<vmem>>, %arg4: memref<1x128xf32, #tpu.memory_space<vmem>>, %arg5: memref<128x128xf32, #tpu.memory_space<vmem>>, %arg6: memref<128x128xf32, #tpu.memory_space<vmem>>, %arg7: memref<1x16x16x128xf32, #tpu.memory_space<vmem>>) attributes {dimension_semantics = [#tpu.dimension_semantics<parallel>], iteration_bounds = array<i64: 2>, scalar_prefetch = 0 : i64, scratch_operands = 0 : i64, tpu.core_type = #tpu.core_type<tc>, window_params = [{transform_indices = @transform_0, window_bounds = array<i64: 1, 16, 16, 128>}, {pipeline_mode = #tpu.pipeline_mode<synchronous>, transform_indices = @transform_1, window_bounds = array<i64: 128, 128>}, {pipeline_mode = #tpu.pipeline_mode<synchronous>, transform_indices = @transform_2, window_bounds = array<i64: 1, 128>}, {pipeline_mode = #tpu.pipeline_mode<synchronous>, transform_indices = @transform_3, window_bounds = array<i64: 1, 128>}, {pipeline_mode = #tpu.pipeline_mode<synchronous>, transform_indices = @transform_4, window_bounds = array<i64: 128, 128>}, {pipeline_mode = #tpu.pipeline_mode<synchronous>, transform_indices = @transform_5, window_bounds = array<i64: 128, 128>}, {transform_indices = @transform_6, window_bounds = array<i64: 1, 16, 16, 128>}]} {
    %c0 = arith.constant 0 : index
    %c0_0 = arith.constant 0 : index
    %c0_1 = arith.constant 0 : index
    %c0_2 = arith.constant 0 : index
    %0 = vector.load %arg1[%c0, %c0_0, %c0_1, %c0_2] : memref<1x16x16x128xf32, #tpu.memory_space<vmem>>, vector<1x16x16x128xf32>
    %1 = vector.shape_cast %0 : vector<1x16x16x128xf32> to vector<16x16x128xf32>
    %cst = arith.constant dense<0.000000e+00> : vector<16x128xf32>
    %2 = vector.multi_reduction <add>, %1, %cst [1] : vector<16x16x128xf32> to vector<16x128xf32>
    %cst_3 = arith.constant 6.250000e-02 : f32
    %3 = vector.broadcast %cst_3 : f32 to vector<16x128xf32>
    %4 = arith.mulf %2, %3 : vector<16x128xf32>
    %cst_4 = arith.constant dense<0.000000e+00> : vector<16x128xf32>
    %5 = vector.multi_reduction <add>, %1, %cst_4 [0] : vector<16x16x128xf32> to vector<16x128xf32>
    %cst_5 = arith.constant 6.250000e-02 : f32
    %6 = vector.broadcast %cst_5 : f32 to vector<16x128xf32>
    %7 = arith.mulf %5, %6 : vector<16x128xf32>
    %c0_6 = arith.constant 0 : index
    %c0_7 = arith.constant 0 : index
    %8 = vector.load %arg2[%c0_6, %c0_7] : memref<128x128xf32, #tpu.memory_space<vmem>>, vector<128x128xf32>
    %c0_8 = arith.constant 0 : index
    %c0_9 = arith.constant 0 : index
    %9 = vector.load %arg3[%c0_8, %c0_9] : memref<1x128xf32, #tpu.memory_space<vmem>>, vector<1x128xf32>
    %c0_10 = arith.constant 0 : index
    %c0_11 = arith.constant 0 : index
    %10 = vector.load %arg4[%c0_10, %c0_11] : memref<1x128xf32, #tpu.memory_space<vmem>>, vector<1x128xf32>
    %cst_12 = arith.constant dense<0.000000e+00> : vector<16x128xf32>
    %11 = tpu.matmul %4, %8, %cst_12 {dimension_numbers = #tpu.dot_dimension_numbers<[1], [0], [0], [1], [0, 0, 1, 1], [], []>} : vector<16x128xf32>, vector<128x128xf32>, vector<16x128xf32> -> vector<16x128xf32>
    %cst_13 = arith.constant dense<0.000000e+00> : vector<16x128xf32>
    %12 = tpu.matmul %7, %8, %cst_13 {dimension_numbers = #tpu.dot_dimension_numbers<[1], [0], [0], [1], [0, 0, 1, 1], [], []>} : vector<16x128xf32>, vector<128x128xf32>, vector<16x128xf32> -> vector<16x128xf32>
    %13 = vector.broadcast %9 : vector<1x128xf32> to vector<16x128xf32>
    %14 = arith.mulf %11, %13 : vector<16x128xf32>
    %15 = vector.broadcast %10 : vector<1x128xf32> to vector<16x128xf32>
    %16 = arith.addf %14, %15 : vector<16x128xf32>
    %cst_14 = arith.constant 0.000000e+00 : f32
    %17 = vector.broadcast %cst_14 : f32 to vector<16x128xf32>
    %18 = arith.maximumf %16, %17 : vector<16x128xf32>
    %19 = vector.broadcast %9 : vector<1x128xf32> to vector<16x128xf32>
    %20 = arith.mulf %12, %19 : vector<16x128xf32>
    %21 = vector.broadcast %10 : vector<1x128xf32> to vector<16x128xf32>
    %22 = arith.addf %20, %21 : vector<16x128xf32>
    %cst_15 = arith.constant 0.000000e+00 : f32
    %23 = vector.broadcast %cst_15 : f32 to vector<16x128xf32>
    %24 = arith.maximumf %22, %23 : vector<16x128xf32>
    %c0_16 = arith.constant 0 : index
    %c0_17 = arith.constant 0 : index
    %25 = vector.load %arg5[%c0_16, %c0_17] : memref<128x128xf32, #tpu.memory_space<vmem>>, vector<128x128xf32>
    %cst_18 = arith.constant dense<0.000000e+00> : vector<16x128xf32>
    %26 = tpu.matmul %18, %25, %cst_18 {dimension_numbers = #tpu.dot_dimension_numbers<[1], [0], [0], [1], [0, 0, 1, 1], [], []>} : vector<16x128xf32>, vector<128x128xf32>, vector<16x128xf32> -> vector<16x128xf32>
    %27 = arith.negf %26 : vector<16x128xf32>
    %28 = math.exp %27 : vector<16x128xf32>
    %cst_19 = arith.constant 1.000000e+00 : f32
    %29 = vector.broadcast %cst_19 : f32 to vector<16x128xf32>
    %30 = arith.addf %29, %28 : vector<16x128xf32>
    %31 = arith.divf %29, %30 : vector<16x128xf32>
    %c0_20 = arith.constant 0 : index
    %c0_21 = arith.constant 0 : index
    %32 = vector.load %arg6[%c0_20, %c0_21] : memref<128x128xf32, #tpu.memory_space<vmem>>, vector<128x128xf32>
    %cst_22 = arith.constant dense<0.000000e+00> : vector<16x128xf32>
    %33 = tpu.matmul %24, %32, %cst_22 {dimension_numbers = #tpu.dot_dimension_numbers<[1], [0], [0], [1], [0, 0, 1, 1], [], []>} : vector<16x128xf32>, vector<128x128xf32>, vector<16x128xf32> -> vector<16x128xf32>
    %34 = arith.negf %33 : vector<16x128xf32>
    %35 = math.exp %34 : vector<16x128xf32>
    %cst_23 = arith.constant 1.000000e+00 : f32
    %36 = vector.broadcast %cst_23 : f32 to vector<16x128xf32>
    %37 = arith.addf %36, %35 : vector<16x128xf32>
    %38 = arith.divf %36, %37 : vector<16x128xf32>
    %39 = vector.shape_cast %31 : vector<16x128xf32> to vector<16x1x128xf32>
    %40 = vector.shape_cast %38 : vector<16x128xf32> to vector<1x16x128xf32>
    %41 = vector.broadcast %39 : vector<16x1x128xf32> to vector<16x16x128xf32>
    %42 = vector.broadcast %40 : vector<1x16x128xf32> to vector<16x16x128xf32>
    %43 = arith.mulf %41, %42 : vector<16x16x128xf32>
    %44 = arith.mulf %43, %1 : vector<16x16x128xf32>
    %c0_24 = arith.constant 0 : index
    %c0_25 = arith.constant 0 : index
    %c0_26 = arith.constant 0 : index
    %c0_27 = arith.constant 0 : index
    %45 = vector.load %arg7[%c0_24, %c0_25, %c0_26, %c0_27] : memref<1x16x16x128xf32, #tpu.memory_space<vmem>>, vector<1x16x16x128xf32>
    %46 = vector.shape_cast %45 : vector<1x16x16x128xf32> to vector<16x16x128xf32>
    %47 = vector.shape_cast %44 : vector<16x16x128xf32> to vector<1x16x16x128xf32>
    tpu.vector_store %arg7[%c0_24, %c0_25, %c0_26, %c0_27], %47 {strides = array<i32>} : memref<1x16x16x128xf32, #tpu.memory_space<vmem>>, vector<1x16x16x128xf32>,
    return
  }
  func.func @transform_0(%arg0: i32) -> (i32, i32, i32, i32) {
    %c0_i32 = arith.constant 0 : i32
    %c0_i32_0 = arith.constant 0 : i32
    %c0_i32_1 = arith.constant 0 : i32
    %c0_i32_2 = arith.constant 0 : i32
    return %arg0, %c0_i32, %c0_i32_0, %c0_i32_1 : i32, i32, i32, i32
  }
  func.func @transform_1(%arg0: i32) -> (i32, i32) {
    %c0_i32 = arith.constant 0 : i32
    %c0_i32_0 = arith.constant 0 : i32
    %c0_i32_1 = arith.constant 0 : i32
    return %c0_i32, %c0_i32_0 : i32, i32
  }
  func.func @transform_2(%arg0: i32) -> (i32, i32) {
    %c0_i32 = arith.constant 0 : i32
    %c0_i32_0 = arith.constant 0 : i32
    %c0_i32_1 = arith.constant 0 : i32
    return %c0_i32, %c0_i32_0 : i32, i32
  }
  func.func @transform_3(%arg0: i32) -> (i32, i32) {
    %c0_i32 = arith.constant 0 : i32
    %c0_i32_0 = arith.constant 0 : i32
    %c0_i32_1 = arith.constant 0 : i32
    return %c0_i32, %c0_i32_0 : i32, i32
  }
  func.func @transform_4(%arg0: i32) -> (i32, i32) {
    %c0_i32 = arith.constant 0 : i32
    %c0_i32_0 = arith.constant 0 : i32
    %c0_i32_1 = arith.constant 0 : i32
    return %c0_i32, %c0_i32_0 : i32, i32
  }
  func.func @transform_5(%arg0: i32) -> (i32, i32) {
    %c0_i32 = arith.constant 0 : i32
    %c0_i32_0 = arith.constant 0 : i32
    %c0_i32_1 = arith.constant 0 : i32
    return %c0_i32, %c0_i32_0 : i32, i32
  }
  func.func @transform_6(%arg0: i32) -> (i32, i32, i32, i32) {
    %c0_i32 = arith.constant 0 : i32
    %c0_i32_0 = arith.constant 0 : i32
    %c0_i32_1 = arith.constant 0 : i32
    %c0_i32_2 = arith.constant 0 : i32
    return %arg0, %c0_i32, %c0_i32_0, %c0_i32_1 : i32, i32, i32, i32
  }
}

</mosaic_0001>

<bundles_post_ra>
// kernel: coordinate_attention.1
= control target key start
LH: loop header
LB: loop body
LE: loop exit
PB: predicated region body
PF: predicated region fallthrough
CT: control target
= control target key end

     0   :  { %s1004_s21 = smov 0   ;;  %s1518_s0 = inlined_call_operand.vmem [shape: f32[2,16,16,128], index: 0, kind: input, shape index: {}, may-alias: {0,6}]   ;;  %s1519_s1 = inlined_call_operand.vmem [shape: f32[128,128], index: 1, kind: input, shape index: {}]   ;;  %s1520_s2 = inlined_call_operand.vmem [shape: f32[1,128], index: 2, kind: input, shape index: {}]   ;;  %s1521_s3 = inlined_call_operand.vmem [shape: f32[1,128], index: 3, kind: input, shape index: {}]   ;;  %s1522_s4 = inlined_call_operand.vmem [shape: f32[128,128], index: 4, kind: input, shape index: {}]   ;;  %s1523_s5 = inlined_call_operand.vmem [shape: f32[128,128], index: 5, kind: input, shape index: {}]   ;;  %s1524_s6 = inlined_call_operand.vmem [shape: f32[2,16,16,128], index: 6, kind: output, shape index: {}, may-alias: {0,6}]  }
   0x1 LB: > { %s918_s22 = sadd.s32 4294967295, %s967_s21   ;;  %p922_p0 = scmp.ge.s32.totalorder %s967_s21, 1  ;;  %s967_s21 = sphi %s1004_s21, %s16_s21  }
   0x2   : > { %p212_p1 = scmp.lt.s32.totalorder %s967_s21, 3 }
   0x4   : > { %p213_p2 = pnand %p922_p0, %p212_p1 }
   0x5   : > { %p242_p3 = scmp.lt.s32.totalorder (!%p213_p2), %s918_s22, 1 }
   0x6   : > { %216 = sbr.rel (%p213_p2) target bundleno = 399 (0x18f), region = 44 }
   0xb   : > { %v459_v0 = vld [vmem:[%s1519_s1 + $0x78] sm:$0xff]  ;;  %v458_v1 = vld [vmem:[%s1519_s1 + $0x70] sm:$0xff]  ;;  %v457_v2 = vld [vmem:[%s1519_s1 + $0x68] sm:$0xff]  ;;  %s1526_s22 = smov (!%p242_p3, %s918_s22), 1  ;;  %vm478_vm0 = vcmask 1041409   ;;  %vm480_vm1 = vcmask 1042434  }
   0xc   : > { %501 = vmatpush.msra.mxu0 %v459_v0  ;;  %524 = vmatpush.msra.mxu1 %v459_v0  ;;  %v456_v3 = vld [vmem:[%s1519_s1 + $0x60] sm:$0xff]  ;;  %s933_s7 = sshll.u32 %s1526_s22, 8  ;;  %v455_v4 = vld [vmem:[%s1519_s1 + $0x58] sm:$0xff]  ;;  %v454_v5 = vld [vmem:[%s1519_s1 + $0x50] sm:$0xff]  ;;  %vm482_vm2 = vcmask 1043459   ;;  %vm484_vm3 = vcmask 1044484  }
   0xd   : > { %s1035_s12 = scalar_lea.vmem %s1518_s0, %s933_s7  ;;  %v453_v14 = vld [vmem:[%s1519_s1 + $0x48] sm:$0xff]  ;;  %v452_v39 = vld [vmem:[%s1519_s1 + $0x40] sm:$0xff]  ;;  %v451_v48 = vld [vmem:[%s1519_s1 + $0x38] sm:$0xff]  ;;  %vm486_vm4 = vcmask 1045509   ;;  %vm488_vm5 = vcmask 1046534   ;;  %vm490_vm6 = vcmask 1047559   ;;  %s1392_s23 = scalar_lea.vmem %s1524_s6, %s933_s7 }
   0xe   : > { %502 = vmatpush.msra.mxu0 %v458_v1  ;;  %525 = vmatpush.msra.mxu1 %v458_v1  ;;  %v1041_v6 = vld [vmem:[%s1035_s12] sm:$0xff]  ;;  %v1044_v7 = vld [vmem:[%s1035_s12 + $0x8] sm:$0xff]  ;;  %v1047_v8 = vld [vmem:[%s1035_s12 + $0x10] sm:$0xff] }
   0xf   : > { %v1050_v9 = vld [vmem:[%s1035_s12 + $0x18] sm:$0xff]  ;;  %v1053_v10 = vld [vmem:[%s1035_s12 + $0x20] sm:$0xff]  ;;  %v1056_v11 = vld [vmem:[%s1035_s12 + $0x28] sm:$0xff]  ;;  %v284_v12 = vadd.f32 %v1044_v7, %v1041_v6  ;;  %v412_v13 = vadd.f32 %v1047_v8, %v1041_v6 }
  0x10   : > { %503 = vmatpush.msra.mxu0 %v457_v2  ;;  %526 = vmatpush.msra.mxu1 %v457_v2  ;;  %v1066_v15 = vld [vmem:[%s1035_s12 + $0x30] sm:$0xff]  ;;  %v1069_v16 = vld [vmem:[%s1035_s12 + $0x38] sm:$0xff]  ;;  %v1072_v17 = vld [vmem:[%s1035_s12 + $0x40] sm:$0xff]  ;;  %v291_v18 = vadd.f32 %v1050_v9, %v1047_v8  ;;  %v298_v19 = vadd.f32 %v1056_v11, %v1053_v10  ;;  %v1092_v26 = vadd.f32 %v1050_v9, %v1044_v7 }
  0x11   : > { %v1079_v20 = vld [vmem:[%s1035_s12 + $0x48] sm:$0xff]  ;;  %v1082_v21 = vld [vmem:[%s1035_s12 + $0x50] sm:$0xff]  ;;  %v1085_v22 = vld [vmem:[%s1035_s12 + $0x58] sm:$0xff]  ;;  %v285_v23 = vrot.slane %v284_v12, 4  ;;  %v305_v24 = vadd.f32 %v1069_v16, %v1066_v15  ;;  %v413_v25 = vadd.f32 %v412_v13, %v1053_v10 }
  0x12   : > { %504 = vmatpush.msra.mxu0 %v456_v3  ;;  %527 = vmatpush.msra.mxu1 %v456_v3  ;;  %v1095_v27 = vld [vmem:[%s1035_s12 + $0x60] sm:$0xff]  ;;  %v1098_v28 = vld [vmem:[%s1035_s12 + $0x68] sm:$0xff]  ;;  %v1101_v29 = vld [vmem:[%s1035_s12 + $0x70] sm:$0xff]  ;;  %v292_v30 = vrot.slane %v291_v18, 4  ;;  %v299_v31 = vrot.slane %v298_v19, 4  ;;  %v312_v32 = vadd.f32 %v1079_v20, %v1072_v17  ;;  %v319_v33 = vadd.f32 %v1085_v22, %v1082_v21 }
  0x13   : > { %v1108_v34 = vld [vmem:[%s1035_s12 + $0x78] sm:$0xff]  ;;  %v286_v35 = vadd.f32 %v285_v23, %v284_v12  ;;  %v306_v36 = vrot.slane %v305_v24, 4  ;;  %v326_v37 = vadd.f32 %v1098_v28, %v1095_v27  ;;  %v1113_v38 = vadd.f32 %v413_v25, %v1066_v15  ;;  %v450_v57 = vld [vmem:[%s1519_s1 + $0x30] sm:$0xff]  ;;  %v449_v2 = vld [vmem:[%s1519_s1 + $0x28] sm:$0xff] }
  0x14   : > { %505 = vmatpush.msra.mxu0 %v455_v4  ;;  %528 = vmatpush.msra.mxu1 %v455_v4  ;;  %v293_v40 = vadd.f32 %v292_v30, %v291_v18  ;;  %v300_v41 = vadd.f32 %v299_v31, %v298_v19  ;;  %v313_v42 = vrot.slane %v312_v32, 4  ;;  %v320_v43 = vrot.slane %v319_v33, 4  ;;  %v448_v23 = vld [vmem:[%s1519_s1 + $0x20] sm:$0xff] }
  0x15   : > { %v287_v44 = vrot.slane %v286_v35, 2  ;;  %v307_v45 = vadd.f32 %v306_v36, %v305_v24  ;;  %v327_v46 = vrot.slane %v326_v37, 4  ;;  %v333_v47 = vadd.f32 %v1108_v34, %v1101_v29 }
  0x16   : > { %506 = vmatpush.msra.mxu0 %v454_v5  ;;  %529 = vmatpush.msra.mxu1 %v454_v5  ;;  %v294_v49 = vrot.slane %v293_v40, 2  ;;  %v301_v50 = vrot.slane %v300_v41, 2  ;;  %v314_v51 = vadd.f32 %v313_v42, %v312_v32  ;;  %v321_v52 = vadd.f32 %v320_v43, %v319_v33 }
  0x17   : > { %v288_v53 = vadd.f32 %v287_v44, %v286_v35  ;;  %v308_v54 = vrot.slane %v307_v45, 2  ;;  %v328_v55 = vadd.f32 %v327_v46, %v326_v37  ;;  %v334_v56 = vrot.slane %v333_v47, 4  ;;  %v1133_v37 = vld [vmem:[%s1035_s12 + $0x80] sm:$0xff] }
  0x18   : > { %507 = vmatpush.msra.mxu0 %v453_v14  ;;  %530 = vmatpush.msra.mxu1 %v453_v14  ;;  %v295_v58 = vadd.f32 %v294_v49, %v293_v40  ;;  %v302_v59 = vadd.f32 %v301_v50, %v300_v41  ;;  %v315_v60 = vrot.slane %v314_v51, 2  ;;  %v322_v61 = vrot.slane %v321_v52, 2  ;;  %v447_v40 = vld [vmem:[%s1519_s1 + $0x18] sm:$0xff]  ;;  %v1145_v49 = vld [vmem:[%s1035_s12 + $0xa0] sm:$0xff] }
  0x19   : > { %v289_v62 = vrot.slane %v288_v53, 1  ;;  %v309_v63 = vadd.f32 %v308_v54, %v307_v45  ;;  %v329_v0 = vrot.slane %v328_v55, 2  ;;  %v335_v1 = vadd.f32 %v334_v56, %v333_v47  ;;  %v1142_v45 = vld [vmem:[%s1035_s12 + $0x90] sm:$0xff] }
  0x1a   : > { %508 = vmatpush.msra.mxu0 %v452_v39  ;;  %531 = vmatpush.msra.mxu1 %v452_v39  ;;  %v296_v3 = vrot.slane %v295_v58, 1  ;;  %v303_v4 = vrot.slane %v302_v59, 1  ;;  %v316_v5 = vadd.f32 %v315_v60, %v314_v51  ;;  %v323_v12 = vadd.f32 %v322_v61, %v321_v52  ;;  %v1136_v39 = vld [vmem:[%s1035_s12 + $0x88] sm:$0xff]  ;;  %v1150_v51 = vld [vmem:[%s1035_s12 + $0x98] sm:$0xff] }
  0x1b   : > { %v290_v13 = vadd.f32 %v289_v62, %v288_v53  ;;  %v310_v14 = vrot.slane %v309_v63, 1  ;;  %v330_v18 = vadd.f32 %v329_v0, %v328_v55  ;;  %v336_v19 = vrot.slane %v335_v1, 2  ;;  %v1153_v52 = vld [vmem:[%s1035_s12 + $0xa8] sm:$0xff]  ;;  %v446_v53 = vld [vmem:[%s1519_s1 + $0x10] sm:$0xff] }
  0x1c   : > { %509 = vmatpush.msra.mxu0 %v451_v48  ;;  %532 = vmatpush.msra.mxu1 %v451_v48  ;;  %v297_v24 = vadd.f32 %v296_v3, %v295_v58  ;;  %v304_v25 = vadd.f32 %v303_v4, %v302_v59  ;;  %v317_v30 = vrot.slane %v316_v5, 1  ;;  %v324_v31 = vrot.slane %v323_v12, 1  ;;  %v1163_v58 = vld [vmem:[%s1035_s12 + $0xb8] sm:$0xff] }
  0x1d   : > { %v311_v32 = vadd.f32 %v310_v14, %v309_v63  ;;  %v331_v33 = vrot.slane %v330_v18, 1  ;;  %v337_v35 = vadd.f32 %v336_v19, %v335_v1  ;;  %v396_v36 = vmul.f32 0.0625, %v290_v13  ;;  %v445_v63 = vld [vmem:[%s1519_s1 + $0x8] sm:$0xff]  ;;  %v1174_v1 = vld [vmem:[%s1035_s12 + $0xc0] sm:$0xff] }
  0x1e   : > { %510 = vmatpush.msra.mxu0 %v450_v57  ;;  %533 = vmatpush.msra.mxu1 %v450_v57  ;;  %v318_v41 = vadd.f32 %v317_v30, %v316_v5  ;;  %v325_v42 = vadd.f32 %v324_v31, %v323_v12  ;;  %v397_v43 = vmul.f32 0.0625, %v297_v24  ;;  %v398_v44 = vmul.f32 0.0625, %v304_v25  ;;  %v1160_v57 = vld [vmem:[%s1035_s12 + $0xb0] sm:$0xff]  ;;  %v444_v19 = vld [vmem:[%s1519_s1] sm:$0xff]  ;;  %v1195_v25 = vld [vmem:[%s1035_s12 + $0xd8] sm:$0xff] }
  0x1f   : > { %v332_v46 = vadd.f32 %v331_v33, %v330_v18  ;;  %v338_v47 = vrot.slane %v337_v35, 1  ;;  %v399_v48 = vmul.f32 0.0625, %v311_v32  ;;  %v415_v50 = vadd.f32 %v1113_v38, %v1072_v17  ;;  %v1192_v24 = vld [vmem:[%s1035_s12 + $0xd0] sm:$0xff] }
  0x20   : > { %511 = vmatpush.msra.mxu0 %v449_v2  ;;  %534 = vmatpush.msra.mxu1 %v449_v2  ;;  %v400_v54 = vmul.f32 0.0625, %v318_v41  ;;  %v401_v55 = vmul.f32 0.0625, %v325_v42  ;;  %v479_v56 = vsel %vm478_vm0, %v397_v43, %v396_v36  ;;  %v340_v38 = vadd.f32 %v1136_v39, %v1133_v37  ;;  %v1177_v2 = vld [vmem:[%s1035_s12 + $0xc8] sm:$0xff] }
  0x21   : > { %v339_v59 = vadd.f32 %v338_v47, %v337_v35  ;;  %v402_v60 = vmul.f32 0.0625, %v332_v46  ;;  %v481_v61 = vsel %vm480_vm1, %v398_v44, %v479_v56  ;;  %v416_v62 = vadd.f32 %v415_v50, %v1082_v21  ;;  %v1199_v35 = vld [vmem:[%s1035_s12 + $0xe0] sm:$0xff] }
  0x22   : > { %512 = vmatpush.msra.mxu0 %v448_v23  ;;  %535 = vmatpush.msra.mxu1 %v448_v23  ;;  %v483_v0 = vsel %vm482_vm2, %v399_v48, %v481_v61  ;;  %v341_v3 = vrot.slane %v340_v38, 4  ;;  %v347_v4 = vadd.f32 %v1150_v51, %v1142_v45  ;;  %v354_v5 = vadd.f32 %v1153_v52, %v1145_v49 }
  0x23   : > { %v403_v12 = vmul.f32 0.0625, %v339_v59  ;;  %v485_v13 = vsel %vm484_vm3, %v400_v54, %v483_v0  ;;  %v417_v14 = vadd.f32 %v416_v62, %v1095_v27  ;;  %v361_v18 = vadd.f32 %v1163_v58, %v1160_v57 }
  0x24   : > { %513 = vmatpush.msra.mxu0 %v447_v40  ;;  %536 = vmatpush.msra.mxu1 %v447_v40  ;;  %v487_v23 = vsel %vm486_vm4, %v401_v55, %v485_v13  ;;  %v342_v30 = vadd.f32 %v341_v3, %v340_v38  ;;  %v348_v31 = vrot.slane %v347_v4, 4  ;;  %v355_v32 = vrot.slane %v354_v5, 4  ;;  %v1203_v40 = vld [vmem:[%s1035_s12 + $0xe8] sm:$0xff] }
  0x25   : > { %v489_v33 = vsel %vm488_vm5, %v402_v60, %v487_v23  ;;  %v418_v36 = vadd.f32 %v417_v14, %v1101_v29  ;;  %v362_v41 = vrot.slane %v361_v18, 4  ;;  %v368_v42 = vadd.f32 %v1177_v2, %v1174_v1  ;;  %v1219_v14 = vld [vmem:[%s1035_s12 + $0xf8] sm:$0xff] }
  0x26   : > { %514 = vmatpush.msra.mxu0 %v446_v53  ;;  %537 = vmatpush.msra.mxu1 %v446_v53  ;;  %v491_v43 = vsel %vm490_vm6, %v403_v12, %v489_v33  ;;  %v343_v44 = vrot.slane %v342_v30, 2  ;;  %v349_v46 = vadd.f32 %v348_v31, %v347_v4  ;;  %v356_v47 = vadd.f32 %v355_v32, %v354_v5  ;;  %v1215_v12 = vld [vmem:[%s1035_s12 + $0xf0] sm:$0xff] }
  0x27   : > { %v419_v48 = vadd.f32 %v418_v36, %v1133_v37  ;;  %v363_v50 = vadd.f32 %v362_v41, %v361_v18  ;;  %v369_v53 = vrot.slane %v368_v42, 4  ;;  %v375_v54 = vadd.f32 %v1195_v25, %v1192_v24 }
  0x28   : > { %515 = vmatpush.msra.mxu0 %v445_v63  ;;  %538 = vmatpush.msra.mxu1 %v445_v63  ;;  %v344_v55 = vadd.f32 %v343_v44, %v342_v30  ;;  %v350_v56 = vrot.slane %v349_v46, 2  ;;  %v357_v38 = vrot.slane %v356_v47, 2  ;;  %v382_v59 = vadd.f32 %v1203_v40, %v1199_v35 }
  0x29   : > { %v420_v60 = vadd.f32 %v419_v48, %v1142_v45  ;;  %v364_v61 = vrot.slane %v363_v50, 2  ;;  %v370_v62 = vadd.f32 %v369_v53, %v368_v42  ;;  %v376_v63 = vrot.slane %v375_v54, 4 }
  0x2a   : > { %516 = vmatpush.msra.mxu0 %v444_v19  ;;  %539 = vmatpush.msra.mxu1 %v444_v19  ;;  %v345_v0 = vrot.slane %v344_v55, 1  ;;  %v351_v3 = vadd.f32 %v350_v56, %v349_v46  ;;  %v358_v4 = vadd.f32 %v357_v38, %v356_v47  ;;  %v383_v5 = vrot.slane %v382_v59, 4 }
  0x2b   : > { %517 = vmatmul.f32.vlgmr.msra.gmra.mxu0 %v491_v43  ;;  %v421_v13 = vadd.f32 %v420_v60, %v1145_v49  ;;  %v365_v18 = vadd.f32 %v364_v61, %v363_v50  ;;  %v371_v19 = vrot.slane %v370_v62, 2  ;;  %v377_v23 = vadd.f32 %v376_v63, %v375_v54 }
  0x2c   : > { %v346_v30 = vadd.f32 %v345_v0, %v344_v55  ;;  %v352_v31 = vrot.slane %v351_v3, 1  ;;  %v359_v32 = vrot.slane %v358_v4, 1  ;;  %v384_v33 = vadd.f32 %v383_v5, %v382_v59 }
  0x2d   : > { %v422_v36 = vadd.f32 %v421_v13, %v1160_v57  ;;  %v366_v41 = vrot.slane %v365_v18, 1  ;;  %v372_v42 = vadd.f32 %v371_v19, %v370_v62  ;;  %v378_v43 = vrot.slane %v377_v23, 2  ;;  %v579_v19 = vld [vmem:[%s1522_s4 + $0x70] sm:$0xff] }
  0x2e   : > { %v353_v44 = vadd.f32 %v352_v31, %v351_v3  ;;  %v360_v46 = vadd.f32 %v359_v32, %v358_v4  ;;  %v385_v47 = vrot.slane %v384_v33, 2  ;;  %v389_v48 = vadd.f32 %v1219_v14, %v1215_v12 }
  0x2f   : > { %v423_v53 = vadd.f32 %v422_v36, %v1174_v1  ;;  %v367_v50 = vadd.f32 %v366_v41, %v365_v18  ;;  %v373_v56 = vrot.slane %v372_v42, 1  ;;  %v379_v54 = vadd.f32 %v378_v43, %v377_v23  ;;  %v580_v18 = vld [vmem:[%s1522_s4 + $0x78] sm:$0xff] }
  0x30   : > { %v386_v55 = vadd.f32 %v385_v47, %v384_v33  ;;  %v390_v38 = vrot.slane %v389_v48, 4  ;;  %v404_v60 = vmul.f32 0.0625, %v346_v30  ;;  %v405_v59 = vmul.f32 0.0625, %v353_v44  ;;  %581 = vmatpush.msra.mxu2 %v580_v18  ;;  %v657_v33 = vld [vmem:[%s1523_s5 + $0x78] sm:$0xff]  ;;  %v578_v44 = vld [vmem:[%s1522_s4 + $0x68] sm:$0xff]  ;;  %v652_v18 = vld [vmem:[%s1523_s5 + $0x50] sm:$0xff] }
  0x31   : > { %v424_v61 = vadd.f32 %v423_v53, %v1192_v24  ;;  %v374_v63 = vadd.f32 %v373_v56, %v372_v42  ;;  %v380_v62 = vrot.slane %v379_v54, 1  ;;  %v406_v0 = vmul.f32 0.0625, %v360_v46  ;;  %658 = vmatpush.msra.mxu3 %v657_v33  ;;  %v656_v46 = vld [vmem:[%s1523_s5 + $0x70] sm:$0xff] }
  0x32   : > { %v387_v3 = vrot.slane %v386_v55, 1  ;;  %v391_v4 = vadd.f32 %v390_v38, %v389_v48  ;;  %v407_v5 = vmul.f32 0.0625, %v367_v50  ;;  %v492_v13 = vsel %vm478_vm0, %v405_v59, %v404_v60  ;;  %582 = vmatpush.msra.mxu2 %v579_v19  ;;  %v655_v50 = vld [vmem:[%s1523_s5 + $0x68] sm:$0xff]  ;;  %v654_v60 = vld [vmem:[%s1523_s5 + $0x60] sm:$0xff] }
  0x33   : > { %v425_v23 = vadd.f32 %v424_v61, %v1199_v35  ;;  %v381_v30 = vadd.f32 %v380_v62, %v379_v54  ;;  %v408_v31 = vmul.f32 0.0625, %v374_v63  ;;  %v493_v32 = vsel %vm480_vm1, %v406_v0, %v492_v13  ;;  %v577_v54 = vld [vmem:[%s1522_s4 + $0x60] sm:$0xff]  ;;  %659 = vmatpush.msra.mxu3 %v656_v46  ;;  %v576_v62 = vld [vmem:[%s1522_s4 + $0x58] sm:$0xff] }
  0x34   : > { %v388_v36 = vadd.f32 %v387_v3, %v386_v55  ;;  %v392_v41 = vrot.slane %v391_v4, 2  ;;  %v494_v42 = vsel %vm482_vm2, %v407_v5, %v493_v32  ;;  %v428_v43 = vadd.f32 %v1092_v26, %v1056_v11  ;;  %583 = vmatpush.msra.mxu2 %v578_v44  ;;  %v653_v0 = vld [vmem:[%s1523_s5 + $0x58] sm:$0xff]  ;;  %v575_v5 = vld [vmem:[%s1522_s4 + $0x50] sm:$0xff] }
  0x35   : > { %v426_v47 = vadd.f32 %v425_v23, %v1215_v12  ;;  %v409_v48 = vmul.f32 0.0625, %v381_v30  ;;  %v495_v53 = vsel %vm484_vm3, %v408_v31, %v494_v42  ;;  %660 = vmatpush.msra.mxu3 %v655_v50  ;;  %v574_v30 = vld [vmem:[%s1522_s4 + $0x48] sm:$0xff]  ;;  %v649_v44 = vld [vmem:[%s1523_s5 + $0x38] sm:$0xff] }
  0x36   : > { %v393_v26 = vadd.f32 %v392_v41, %v391_v4  ;;  %v429_v56 = vadd.f32 %v428_v43, %v1069_v16  ;;  %v410_v38 = vmul.f32 0.0625, %v388_v36  ;;  %584 = vmatpush.msra.mxu2 %v577_v54  ;;  %v651_v31 = vld [vmem:[%s1523_s5 + $0x48] sm:$0xff]  ;;  %v573_v36 = vld [vmem:[%s1522_s4 + $0x40] sm:$0xff]  ;;  %v572_v43 = vld [vmem:[%s1522_s4 + $0x38] sm:$0xff] }
  0x37   : > { %v442_v55 = vmul.f32 0.0625, %v426_v47  ;;  %v496_v61 = vsel %vm486_vm4, %v409_v48, %v495_v53  ;;  %661 = vmatpush.msra.mxu3 %v654_v60  ;;  %v650_v41 = vld [vmem:[%s1523_s5 + $0x40] sm:$0xff]  ;;  %v571_v47 = vld [vmem:[%s1522_s4 + $0x30] sm:$0xff]  ;;  %v570_v53 = vld [vmem:[%s1522_s4 + $0x28] sm:$0xff] }
  0x38   : > { %v394_v59 = vrot.slane %v393_v26, 1  ;;  %v430_v63 = vadd.f32 %v429_v56, %v1079_v20  ;;  %v497_v13 = vsel %vm488_vm5, %v410_v38, %v496_v61  ;;  %585 = vmatpush.msra.mxu2 %v576_v62  ;;  %v648_v61 = vld [vmem:[%s1523_s5 + $0x30] sm:$0xff]  ;;  %v647_v62 = vld [vmem:[%s1523_s5 + $0x28] sm:$0xff] }
  0x39   : > { %540 = vmatmul.f32.vlgmr.msra.gmra.mxu1 %v442_v55  ;;  %662 = vmatpush.msra.mxu3 %v653_v0  ;;  %v566_v0 = vld [vmem:[%s1522_s4 + $0x8] sm:$0xff] }
  0x3a   : > { %v395_v3 = vadd.f32 %v394_v59, %v393_v26  ;;  %v431_v4 = vadd.f32 %v430_v63, %v1085_v22  ;;  %586 = vmatpush.msra.mxu2 %v575_v5  ;;  %v569_v26 = vld [vmem:[%s1522_s4 + $0x20] sm:$0xff]  ;;  %v568_v59 = vld [vmem:[%s1522_s4 + $0x18] sm:$0xff]  ;;  %v567_v63 = vld [vmem:[%s1522_s4 + $0x10] sm:$0xff] }
  0x3b   : > { %663 = vmatpush.msra.mxu3 %v652_v18  ;;  %v645_v5 = vld [vmem:[%s1523_s5 + $0x18] sm:$0xff]  ;;  %v643_v18 = vld [vmem:[%s1523_s5 + $0x8] sm:$0xff] }
  0x3c   : > { %v411_v19 = vmul.f32 0.0625, %v395_v3  ;;  %v432_v23 = vadd.f32 %v431_v4, %v1098_v28  ;;  %587 = vmatpush.msra.mxu2 %v574_v30  ;;  %v646_v3 = vld [vmem:[%s1523_s5 + $0x20] sm:$0xff] }
  0x3d   : > { %664 = vmatpush.msra.mxu3 %v651_v31  ;;  %v565_v4 = vld [vmem:[%s1522_s4] sm:$0xff] }
  0x3e   : > { %v498_v32 = vsel %vm490_vm6, %v411_v19, %v497_v13  ;;  %v433_v33 = vadd.f32 %v432_v23, %v1108_v34  ;;  %588 = vmatpush.msra.mxu2 %v573_v36  ;;  %v644_v13 = vld [vmem:[%s1523_s5 + $0x10] sm:$0xff]  ;;  %v642_v19 = vld [vmem:[%s1523_s5] sm:$0xff] }
  0x3f   : > { %520 = vmatmul.f32.gmra.mxu0 %v498_v32  ;;  %665 = vmatpush.msra.mxu3 %v650_v41  ;;  %v943_v23 = vld [vmem:[%s1520_s2] ss:$0 sm:$0xff] }
  0x40   : > { %v434_v42 = vadd.f32 %v433_v33, %v1136_v39  ;;  %589 = vmatpush.msra.mxu2 %v572_v43  ;;  %v944_v30 = vld [vmem:[%s1521_s3] ss:$0 sm:$0xff] }
  0x41   : > { %666 = vmatpush.msra.mxu3 %v649_v44 }
  0x42   : > { %v435_v46 = vadd.f32 %v434_v42, %v1150_v51  ;;  %590 = vmatpush.msra.mxu2 %v571_v47 }
  0x43   : > { %667 = vmatpush.msra.mxu3 %v648_v61 }
  0x44   : > { %v436_v48 = vadd.f32 %v435_v46, %v1153_v52  ;;  %591 = vmatpush.msra.mxu2 %v570_v53 }
  0x45   : > { %668 = vmatpush.msra.mxu3 %v647_v62 }
  0x46   : > { %v437_v50 = vadd.f32 %v436_v48, %v1163_v58  ;;  %592 = vmatpush.msra.mxu2 %v569_v26 }
  0x47   : > { %669 = vmatpush.msra.mxu3 %v646_v3 }
  0x48   : > { %v438_v56 = vadd.f32 %v437_v50, %v1177_v2  ;;  %593 = vmatpush.msra.mxu2 %v568_v59 }
  0x49   : > { %670 = vmatpush.msra.mxu3 %v645_v5 }
  0x4a   : > { %v439_v54 = vadd.f32 %v438_v56, %v1195_v25  ;;  %594 = vmatpush.msra.mxu2 %v567_v63 }
  0x4b   : > { %671 = vmatpush.msra.mxu3 %v644_v13 }
  0x4c   : > { %v440_v55 = vadd.f32 %v439_v54, %v1203_v40  ;;  %595 = vmatpush.msra.mxu2 %v566_v0 }
  0x4d   : > { %672 = vmatpush.msra.mxu3 %v643_v18 }
  0x4e   : > { %v441_v38 = vadd.f32 %v440_v55, %v1219_v14  ;;  %596 = vmatpush.msra.mxu2 %v565_v4 }
  0x4f   : > { %673 = vmatpush.msra.mxu3 %v642_v19 }
  0x50   : > { %v443_v60 = vmul.f32 0.0625, %v441_v38 }
  0x52   : > { %543 = vmatmul.f32.gmra.mxu1 %v443_v60 }
  0xa8   : > { %v518_v31 = vpop.f32.mrf.mxu0 }
  0xa9   : > { %v550_v32 = vmul.f32 %v943_v23, %v518_v31 }
  0xab   : > { %v555_v33 = vadd.f32 %v944_v30, %v550_v32 }
  0xad   : > { %v557_v36 = vmax.f32 %v555_v33, 0.0 }
  0xaf   : > { %597 = vmatmul.f32.vlgmr.msra.gmra.mxu2 %v557_v36 }
  0xb6   : > { %v541_v41 = vpop.f32.mrf.mxu1 }
  0xb7   : > { %v559_v42 = vmul.f32 %v943_v23, %v541_v41 }
  0xb9   : > { %v561_v43 = vadd.f32 %v944_v30, %v559_v42 }
  0xbb   : > { %v563_v44 = vmax.f32 %v561_v43, 0.0 }
  0xbc   : > { %v521_v46 = vpop.f32.mrf.mxu0 }
  0xbd   : > { %v551_v47 = vmul.f32 %v943_v23, %v521_v46  ;;  %674 = vmatmul.f32.vlgmr.msra.gmra.mxu3 %v563_v44 }
  0xbf   : > { %v556_v48 = vadd.f32 %v944_v30, %v551_v47 }
  0xc1   : > { %v558_v53 = vmax.f32 %v556_v48, 0.0 }
  0xc3   : > { %600 = vmatmul.f32.gmra.mxu2 %v558_v53 }
  0xcf   : > { %v544_v50 = vpop.f32.mrf.mxu1 }
  0xd0   : > { %v560_v26 = vmul.f32 %v943_v23, %v544_v50 }
  0xd2   : > { %v562_v56 = vadd.f32 %v944_v30, %v560_v26 }
  0xd4   : > { %v564_v54 = vmax.f32 %v562_v56, 0.0 }
  0xd6   : > { %677 = vmatmul.f32.gmra.mxu3 %v564_v54 }
 0x132   : > { %v598_v55 = vpop.f32.mrf.mxu2 }
 0x133   : > { %v927_v38 = vmul.f32 -1.442695, %v598_v55 }
 0x135   : > { %945 = vpow2.f32 %v927_v38 }
 0x13b   : > { %v946_v60 = vpop.eup %945 }
 0x13c   : > { %v610_v59 = vadd.f32 1.0, %v946_v60 }
 0x13e   : > { %947 = vrcp.f32 %v610_v59  ;;  %v623_v30 = vand.u32 2147483648, %v610_v59  ;;  %vm617_vm8 = vweird.f32 %v610_v59  ;;  %v621_v32 = vand.u32 2147483647, %v610_v59 }
 0x140   : > { %v675_v61 = vpop.f32.mrf.mxu3  ;;  %v624_v41 = vor.u32 1.1754944e-38, %v623_v30  ;;  %vm622_vm10 = vcmp.eq.f32.partialorder %v621_v32, 8.507059e+37 }
 0x141   : > { %v929_v62 = vmul.f32 -1.442695, %v675_v61 }
 0x143   : > { %949 = vpow2.f32 %v929_v62 }
 0x144   : > { %v948_v63 = vpop.eup %947 }
 0x145   : > { %v613_v0 = vmul.f32 %v948_v63, %v610_v59  ;;  %vm618_vm7 = vweird.f32 %v948_v63 }
 0x146   : > { %v601_v4 = vpop.f32.mrf.mxu2  ;;  %vm619_vm9 = vmor %vm617_vm8, %vm618_vm7 }
 0x147   : > { %v614_v3 = vsub.f32 1.0, %v613_v0  ;;  %v928_v5 = vmul.f32 -1.442695, %v601_v4 }
 0x149   : > { %v950_v13 = vpop.eup %949  ;;  %v615_v18 = vmul.f32 %v948_v63, %v614_v3  ;;  %951 = vpow2.f32 %v928_v5 }
 0x14a   : > { %v687_v19 = vadd.f32 1.0, %v950_v13 }
 0x14b   : > { %v616_v23 = vadd.f32 %v948_v63, %v615_v18 }
 0x14c   : > { %953 = vrcp.f32 %v687_v19  ;;  %v700_v60 = vand.u32 2147483648, %v687_v19  ;;  %v698_v62 = vand.u32 2147483647, %v687_v19  ;;  %vm694_vm12 = vweird.f32 %v687_v19 }
 0x14d   : > { %v620_v36 = vsel %vm619_vm9, %v948_v63, %v616_v23 }
 0x14e   : > { %v1355_v42 = vsel %vm622_vm10, %v624_v41, %v620_v36  ;;  %v701_v32 = vor.u32 1.1754944e-38, %v700_v60  ;;  %vm699_vm14 = vcmp.eq.f32.partialorder %v698_v62, 8.507059e+37 }
 0x14f   : > { %v952_v31 = vpop.eup %951  ;;  %v721_v46 = vrot.slane %v1355_v42, 1  ;;  %v722_v47 = vrot.slane %v1355_v42, 2  ;;  %v723_v48 = vrot.slane %v1355_v42, 3  ;;  %v724_v50 = vrot.slane %v1355_v42, 4 }
 0x150   : > { %v1352_v33 = vadd.f32 1.0, %v952_v31  ;;  %v725_v26 = vrot.slane %v1355_v42, 5  ;;  %v726_v56 = vrot.slane %v1355_v42, 6  ;;  %v727_v55 = vrot.slane %v1355_v42, 7 }
 0x151   : > { %v735_v38 = vperm.slane %v1355_v42, 0  ;;  %v1366_v3 = vperm.slane %v721_v46, 0  ;;  %v1368_v4 = vperm.slane %v722_v47, 0  ;;  %v1370_v5 = vperm.slane %v723_v48, 0 }
 0x152   : > { %955 = vrcp.f32 %v1352_v33  ;;  %v954_v43 = vpop.eup %953  ;;  %v1372_v18 = vperm.slane %v724_v50, 0  ;;  %v1374_v30 = vperm.slane %v725_v26, 0  ;;  %v1376_v31 = vperm.slane %v726_v56, 0 }
 0x153   : > { %v690_v44 = vmul.f32 %v954_v43, %v687_v19  ;;  %vm695_vm11 = vweird.f32 %v954_v43  ;;  %v1378_v41 = vperm.slane %v727_v55, 0  ;;  %v636_v46 = vand.u32 2147483647, %v1352_v33 }
 0x154   : > { %vm696_vm13 = vmor %vm694_vm12, %vm695_vm11  ;;  %v638_v19 = vand.u32 2147483648, %v1352_v33  ;;  %vm632_vm0 = vweird.f32 %v1352_v33 }
 0x155   : > { %v691_v54 = vsub.f32 1.0, %v690_v44  ;;  %vm637_vm2 = vcmp.eq.f32.partialorder %v636_v46, 8.507059e+37 }
 0x157   : > { %v692_v63 = vmul.f32 %v954_v43, %v691_v54 }
 0x158   : > { %v956_v53 = vpop.eup %955 }
 0x159   : > { %v628_v59 = vmul.f32 %v956_v53, %v1352_v33  ;;  %v678_v61 = vpop.f32.mrf.mxu3  ;;  %v693_v23 = vadd.f32 %v954_v43, %v692_v63  ;;  %vm633_vm15 = vweird.f32 %v956_v53 }
 0x15a   : > { %v930_v0 = vmul.f32 -1.442695, %v678_v61  ;;  %vm634_vm1 = vmor %vm632_vm0, %vm633_vm15 }
 0x15b   : > { %v629_v13 = vsub.f32 1.0, %v628_v59  ;;  %v697_v44 = vsel %vm696_vm13, %v954_v43, %v693_v23  ;;  %v639_v23 = vor.u32 1.1754944e-38, %v638_v19 }
 0x15c   : > { %957 = vpow2.f32 %v930_v0  ;;  %v702_v47 = vsel %vm699_vm14, %v701_v32, %v697_v44 }
 0x15d   : > { %v630_v36 = vmul.f32 %v956_v53, %v629_v13  ;;  %v767_v50 = vmul.f32 %v735_v38, %v702_v47  ;;  %v769_v26 = vmul.f32 %v1366_v3, %v702_v47  ;;  %v771_v56 = vmul.f32 %v1368_v4, %v702_v47 }
 0x15e   : > { %v773_v54 = vmul.f32 %v1370_v5, %v702_v47  ;;  %v775_v43 = vmul.f32 %v1372_v18, %v702_v47  ;;  %v777_v55 = vmul.f32 %v1374_v30, %v702_v47  ;;  %v779_v60 = vmul.f32 %v1376_v31, %v702_v47 }
 0x15f   : > { %v631_v48 = vadd.f32 %v956_v53, %v630_v36  ;;  %v781_v59 = vmul.f32 %v1378_v41, %v702_v47  ;;  %v799_v63 = vmul.f32 %v767_v50, %v1041_v6  ;;  %v801_v62 = vmul.f32 %v769_v26, %v1047_v8 }
 0x160   : > { %v803_v0 = vmul.f32 %v771_v56, %v1053_v10  ;;  %v805_v13 = vmul.f32 %v773_v54, %v1066_v15  ;;  %v807_v32 = vmul.f32 %v775_v43, %v1072_v17  ;;  %v809_v36 = vmul.f32 %v777_v55, %v1082_v21 }
 0x161   : > { %831 = vst [vmem:[%s1392_s23] sm:$0xff] %v799_v63  ;;  %v635_v44 = vsel %vm634_vm1, %v956_v53, %v631_v48  ;;  %v811_v6 = vmul.f32 %v779_v60, %v1095_v27  ;;  %v813_v8 = vmul.f32 %v781_v59, %v1101_v29 }
 0x162   : > { %v958_v61 = vpop.eup %957  ;;  %833 = vst [vmem:[%s1392_s23 + $0x10] sm:$0xff] %v801_v62  ;;  %v1410_v10 = vsel %vm637_vm2, %v639_v23, %v635_v44 }
 0x163   : > { %v688_v15 = vadd.f32 1.0, %v958_v61  ;;  %835 = vst [vmem:[%s1392_s23 + $0x20] sm:$0xff] %v803_v0  ;;  %v728_v33 = vrot.slane %v1410_v10, 1  ;;  %v729_v17 = vrot.slane %v1410_v10, 2  ;;  %v730_v21 = vrot.slane %v1410_v10, 3 }
 0x164   : > { %v731_v53 = vrot.slane %v1410_v10, 4  ;;  %837 = vst [vmem:[%s1392_s23 + $0x30] sm:$0xff] %v805_v13  ;;  %v732_v27 = vrot.slane %v1410_v10, 5  ;;  %v733_v29 = vrot.slane %v1410_v10, 6  ;;  %v734_v46 = vrot.slane %v1410_v10, 7 }
 0x165   : > { %v743_v48 = vperm.slane %v1410_v10, 0  ;;  %839 = vst [vmem:[%s1392_s23 + $0x40] sm:$0xff] %v807_v32  ;;  %v1423_v19 = vperm.slane %v728_v33, 0  ;;  %v1425_v50 = vperm.slane %v729_v17, 0  ;;  %v1427_v26 = vperm.slane %v730_v21, 0 }
 0x166   : > { %v1429_v56 = vperm.slane %v731_v53, 0  ;;  %841 = vst [vmem:[%s1392_s23 + $0x50] sm:$0xff] %v809_v36  ;;  %v1432_v54 = vperm.slane %v732_v27, 0  ;;  %v1434_v43 = vperm.slane %v733_v29, 0  ;;  %v1436_v55 = vperm.slane %v734_v46, 0 }
 0x167   : > { %v783_v60 = vmul.f32 %v743_v48, %v702_v47  ;;  %843 = vst [vmem:[%s1392_s23 + $0x60] sm:$0xff] %v811_v6  ;;  %v785_v59 = vmul.f32 %v1423_v19, %v702_v47  ;;  %v787_v61 = vmul.f32 %v1425_v50, %v702_v47  ;;  %v789_v63 = vmul.f32 %v1427_v26, %v702_v47 }
 0x168   : > { %v791_v62 = vmul.f32 %v1429_v56, %v702_v47  ;;  %845 = vst [vmem:[%s1392_s23 + $0x70] sm:$0xff] %v813_v8  ;;  %v793_v0 = vmul.f32 %v1432_v54, %v702_v47  ;;  %v795_v13 = vmul.f32 %v1434_v43, %v702_v47  ;;  %v797_v32 = vmul.f32 %v1436_v55, %v702_v47 }
 0x169   : > { %v815_v23 = vmul.f32 %v783_v60, %v1133_v37  ;;  %v817_v36 = vmul.f32 %v785_v59, %v1142_v45  ;;  %v819_v44 = vmul.f32 %v787_v61, %v1145_v49  ;;  %v821_v6 = vmul.f32 %v789_v63, %v1160_v57 }
 0x16a   : > { %v823_v8 = vmul.f32 %v791_v62, %v1174_v1  ;;  %959 = vrcp.f32 %v688_v15  ;;  %v825_v33 = vmul.f32 %v793_v0, %v1192_v24  ;;  %v827_v17 = vmul.f32 %v795_v13, %v1199_v35 }
 0x16b   : > { %847 = vst [vmem:[%s1392_s23 + $0x80] sm:$0xff] %v815_v23  ;;  %v829_v37 = vmul.f32 %v797_v32, %v1215_v12  ;;  %v715_v47 = vand.u32 2147483648, %v688_v15  ;;  %v713_v21 = vand.u32 2147483647, %v688_v15  ;;  %vm709_vm4 = vweird.f32 %v688_v15 }
 0x16c   : > { %849 = vst [vmem:[%s1392_s23 + $0x90] sm:$0xff] %v817_v36 }
 0x16d   : > { %851 = vst [vmem:[%s1392_s23 + $0xa0] sm:$0xff] %v819_v44  ;;  %v716_v24 = vor.u32 1.1754944e-38, %v715_v47  ;;  %vm714_vm6 = vcmp.eq.f32.partialorder %v713_v21, 8.507059e+37 }
 0x16e   : > { %853 = vst [vmem:[%s1392_s23 + $0xb0] sm:$0xff] %v821_v6 }
 0x16f   : > { %855 = vst [vmem:[%s1392_s23 + $0xc0] sm:$0xff] %v823_v8 }
 0x170   : > { %857 = vst [vmem:[%s1392_s23 + $0xd0] sm:$0xff] %v825_v33  ;;  %v960_v45 = vpop.eup %959 }
 0x171   : > { %859 = vst [vmem:[%s1392_s23 + $0xe0] sm:$0xff] %v827_v17  ;;  %v705_v49 = vmul.f32 %v960_v45, %v688_v15  ;;  %vm710_vm3 = vweird.f32 %v960_v45 }
 0x172   : > { %861 = vst [vmem:[%s1392_s23 + $0xf0] sm:$0xff] %v829_v37  ;;  %vm711_vm5 = vmor %vm709_vm4, %vm710_vm3 }
 0x173   : > { %v706_v57 = vsub.f32 1.0, %v705_v49 }
 0x175   : > { %v707_v1 = vmul.f32 %v960_v45, %v706_v57 }
 0x177   : > { %v708_v53 = vadd.f32 %v960_v45, %v707_v1 }
 0x179   : > { %v712_v35 = vsel %vm711_vm5, %v960_v45, %v708_v53 }
 0x17a   : > { %v717_v12 = vsel %vm714_vm6, %v716_v24, %v712_v35 }
 0x17b   : > { %v768_v27 = vmul.f32 %v735_v38, %v717_v12  ;;  %v770_v29 = vmul.f32 %v1366_v3, %v717_v12  ;;  %v772_v46 = vmul.f32 %v1368_v4, %v717_v12  ;;  %v774_v60 = vmul.f32 %v1370_v5, %v717_v12 }
 0x17c   : > { %v776_v59 = vmul.f32 %v1372_v18, %v717_v12  ;;  %v778_v15 = vmul.f32 %v1374_v30, %v717_v12  ;;  %v780_v61 = vmul.f32 %v1376_v31, %v717_v12  ;;  %v782_v3 = vmul.f32 %v1378_v41, %v717_v12 }
 0x17d   : > { %v800_v63 = vmul.f32 %v768_v27, %v1044_v7  ;;  %v802_v42 = vmul.f32 %v770_v29, %v1050_v9  ;;  %v804_v38 = vmul.f32 %v772_v46, %v1056_v11  ;;  %v806_v4 = vmul.f32 %v774_v60, %v1069_v16 }
 0x17e   : > { %v784_v5 = vmul.f32 %v743_v48, %v717_v12  ;;  %v808_v18 = vmul.f32 %v776_v59, %v1079_v20  ;;  %v786_v30 = vmul.f32 %v1423_v19, %v717_v12  ;;  %v810_v7 = vmul.f32 %v778_v15, %v1085_v22 }
 0x17f   : > { %832 = vst [vmem:[%s1392_s23 + $0x8] sm:$0xff] %v800_v63  ;;  %v788_v9 = vmul.f32 %v1425_v50, %v717_v12  ;;  %v812_v11 = vmul.f32 %v780_v61, %v1098_v28  ;;  %v790_v16 = vmul.f32 %v1427_v26, %v717_v12  ;;  %v814_v31 = vmul.f32 %v782_v3, %v1108_v34 }
 0x180   : > { %834 = vst [vmem:[%s1392_s23 + $0x18] sm:$0xff] %v802_v42  ;;  %v792_v20 = vmul.f32 %v1429_v56, %v717_v12  ;;  %v816_v41 = vmul.f32 %v784_v5, %v1136_v39  ;;  %v794_v22 = vmul.f32 %v1432_v54, %v717_v12  ;;  %v818_v28 = vmul.f32 %v786_v30, %v1150_v51 }
 0x181   : > { %836 = vst [vmem:[%s1392_s23 + $0x28] sm:$0xff] %v804_v38  ;;  %v796_v10 = vmul.f32 %v1434_v43, %v717_v12  ;;  %v820_v34 = vmul.f32 %v788_v9, %v1153_v52  ;;  %v798_v48 = vmul.f32 %v1436_v55, %v717_v12  ;;  %v822_v39 = vmul.f32 %v790_v16, %v1163_v58 }
 0x182   : > { %838 = vst [vmem:[%s1392_s23 + $0x38] sm:$0xff] %v806_v4  ;;  %v824_v19 = vmul.f32 %v792_v20, %v1177_v2  ;;  %v826_v51 = vmul.f32 %v794_v22, %v1195_v25 }
 0x183   : > { %840 = vst [vmem:[%s1392_s23 + $0x48] sm:$0xff] %v808_v18  ;;  %v828_v50 = vmul.f32 %v796_v10, %v1203_v40  ;;  %v830_v26 = vmul.f32 %v798_v48, %v1219_v14 }
 0x184   : > { %842 = vst [vmem:[%s1392_s23 + $0x58] sm:$0xff] %v810_v7 }
 0x185   : > { %844 = vst [vmem:[%s1392_s23 + $0x68] sm:$0xff] %v812_v11 }
 0x186   : > { %846 = vst [vmem:[%s1392_s23 + $0x78] sm:$0xff] %v814_v31 }
 0x187   : > { %848 = vst [vmem:[%s1392_s23 + $0x88] sm:$0xff] %v816_v41 }
 0x188   : > { %850 = vst [vmem:[%s1392_s23 + $0x98] sm:$0xff] %v818_v28 }
 0x189   : > { %852 = vst [vmem:[%s1392_s23 + $0xa8] sm:$0xff] %v820_v34 }
 0x18a   : > { %854 = vst [vmem:[%s1392_s23 + $0xb8] sm:$0xff] %v822_v39 }
 0x18b   : > { %856 = vst [vmem:[%s1392_s23 + $0xc8] sm:$0xff] %v824_v19 }
 0x18c   : > { %858 = vst [vmem:[%s1392_s23 + $0xd8] sm:$0xff] %v826_v51 }
 0x18d   : > { %860 = vst [vmem:[%s1392_s23 + $0xe8] sm:$0xff] %v828_v50 }
 0x18e   : > { %862 = vst [vmem:[%s1392_s23 + $0xf8] sm:$0xff] %v830_v26 }
 0x18f PF: > { %s16_s21 = sadd.s32 1, %s967_s21  }
 0x190   : > { %p13_p4 = scmp.ge.s32.totalorder %s16_s21, 4  }
 0x192   :  { %15 = sbr.rel (!%p13_p4) target bundleno = 1 (0x1), region = 74 }

</bundles_post_ra>
